<compile_context>
chip_gen: v7x
topology: tpu7x:2x2x1
jax: 0.10.0
libtpu: 0.0.40
codegen_flags: <defaults>
</compile_context>

<pallas_src>
import functools

import jax
import jax.numpy as jnp
import numpy as np
from jax.experimental import pallas as pl
from jax.experimental.pallas import tpu as pltpu


# ----------------------------------------------------------------------------
# Fused encoder kernel
# ----------------------------------------------------------------------------
def _im2col(p_ref, n_taps, l_full):
    """Lane-concat of n_taps contiguous row-shifted slices of a padded slab.

    p_ref: (Lp, Cin) zero-padded activation slab in VMEM.
    returns (l_full, n_taps*Cin) value, row i = [xp[i+0] | xp[i+1] | ...].
    """
    return jnp.concatenate(
        [p_ref[pl.ds(t, l_full), :] for t in range(n_taps)], axis=1)


def _stride2_sel(l_out, l_full):
    """(l_out, l_full) 0/1 matrix selecting every other im2col row (stride 2)."""
    r = jax.lax.broadcasted_iota(jnp.int32, (l_out, l_full), 0)
    c = jax.lax.broadcasted_iota(jnp.int32, (l_out, l_full), 1)
    return (c == 2 * r).astype(jnp.float32)


def _encoder_kernel(x_ref, w1_ref, b1_ref, w2_ref, b2_ref, w3_ref, b3_ref,
                    wr3_ref, wr1_ref, o_ref, p0_ref, p1_ref, p2_ref,
                    *, l_in, l1, l2, n_res_layers):
    """Entire encoder forward for one batch element (grid iterates batch).

    x_ref  : (l_in, Cin)          input slice (NLC)
    w*_ref : (K*Cin, Cout)        im2col-reshaped conv weights
    b*_ref : (1, Cout)            biases
    wr3_ref: (3*h, res_h), wr1_ref: (res_h, h)   residual-layer weights (no bias)
    o_ref  : (l2, h)              output slice (NLC)
    p0/p1/p2_ref : zero-padded VMEM scratch slabs for the three conv stages.
    """
    f32 = jnp.float32

    # In-kernel zero padding: clear the padded slabs once per batch element.
    p0_ref[...] = jnp.zeros_like(p0_ref)
    p1_ref[...] = jnp.zeros_like(p1_ref)
    p2_ref[...] = jnp.zeros_like(p2_ref)

    # ---- conv1: k=4, s=2, p=1, + ReLU -------------------------------------
    p0_ref[pl.ds(1, l_in), :] = x_ref[...]
    lf0 = l_in + 2 - 4 + 1                       # stride-1 im2col rows
    cols = jnp.dot(_stride2_sel(l1, lf0), _im2col(p0_ref, 4, lf0),
                   preferred_element_type=f32)
    y = jnp.dot(cols, w1_ref[...], preferred_element_type=f32) + b1_ref[...]
    y = jnp.maximum(y, 0.0)

    # ---- conv2: k=4, s=2, p=1, + ReLU -------------------------------------
    p1_ref[pl.ds(1, l1), :] = y
    lf1 = l1 + 2 - 4 + 1
    cols = jnp.dot(_stride2_sel(l2, lf1), _im2col(p1_ref, 4, lf1),
                   preferred_element_type=f32)
    y = jnp.dot(cols, w2_ref[...], preferred_element_type=f32) + b2_ref[...]
    y = jnp.maximum(y, 0.0)

    # ---- conv3: k=3, s=1, p=1 (no ReLU) -----------------------------------
    p2_ref[pl.ds(1, l2), :] = y
    cols = _im2col(p2_ref, 3, l2)
    y = jnp.dot(cols, w3_ref[...], preferred_element_type=f32) + b3_ref[...]

    # ---- residual stack (shared ResidualLayer weights, canonical VQ-VAE) --
    for _ in range(n_res_layers):
        p2_ref[pl.ds(1, l2), :] = jnp.maximum(y, 0.0)   # pad(ReLU(x)); edges stay 0
        cols = _im2col(p2_ref, 3, l2)
        h = jnp.maximum(
            jnp.dot(cols, wr3_ref[...], preferred_element_type=f32), 0.0)
        y = y + jnp.dot(h, wr1_ref[...], preferred_element_type=f32)

    # final ReLU of the ResidualStack
    o_ref[...] = jnp.maximum(y, 0.0)


# ----------------------------------------------------------------------------
# Wrapper: one pallas_call for the whole encoder
# ----------------------------------------------------------------------------
def encoder_forward(x_ncl, params, *, n_res_layers):
    """x_ncl: (B, in_dim, L), exactly like the PyTorch module's input."""
    x = jnp.transpose(x_ncl, (0, 2, 1))            # NCL -> NLC (one-time)
    B, L, Cin = x.shape

    w1, w2, w3 = params["w1"], params["w2"], params["w3"]
    wr3, wr1 = params["wr3"], params["wr1"]
    h_half = w1.shape[-1]
    h_dim = w2.shape[-1]
    res_h = wr3.shape[-1]

    L1 = (L + 2 - 4) // 2 + 1                      # after conv1
    L2 = (L1 + 2 - 4) // 2 + 1                     # after conv2 (== final length)

    # Host-side im2col weight layout: (K, Cin, Cout) -> (K*Cin, Cout)
    w1c = w1.reshape(4 * Cin, h_half)
    w2c = w2.reshape(4 * h_half, h_dim)
    w3c = w3.reshape(3 * h_dim, h_dim)
    wr3c = wr3.reshape(3 * h_dim, res_h)
    wr1c = wr1.reshape(res_h, h_dim)
    b1 = params["b1"].reshape(1, h_half)
    b2 = params["b2"].reshape(1, h_dim)
    b3 = params["b3"].reshape(1, h_dim)

    kernel = functools.partial(_encoder_kernel, l_in=L, l1=L1, l2=L2,
                               n_res_layers=n_res_layers)

    def _const(shape):
        nd = len(shape)
        return pl.BlockSpec(shape, lambda b: (0,) * nd)   # resident, no re-DMA

    out_nlc = pl.pallas_call(
        kernel,
        out_shape=jax.ShapeDtypeStruct((B, L2, h_dim), jnp.float32),
        grid=(B,),
        in_specs=[
            pl.BlockSpec((None, L, Cin), lambda b: (b, 0, 0)),   # x: one batch row
            _const(w1c.shape), _const(b1.shape),
            _const(w2c.shape), _const(b2.shape),
            _const(w3c.shape), _const(b3.shape),
            _const(wr3c.shape), _const(wr1c.shape),
        ],
        out_specs=pl.BlockSpec((None, L2, h_dim), lambda b: (b, 0, 0)),
        scratch_shapes=[
            pltpu.VMEM((L + 2, Cin), jnp.float32),    # padded input slab
            pltpu.VMEM((L1 + 2, h_half), jnp.float32),  # padded conv1 output
            pltpu.VMEM((L2 + 2, h_dim), jnp.float32),   # padded conv2/res slab
        ],
        compiler_params=pltpu.CompilerParams(
            dimension_semantics=("parallel",)),       # batch across TCs on v7x
    )(x, w1c, b1, w2c, b2, w3c, b3, wr3c, wr1c)

    return jnp.transpose(out_nlc, (0, 2, 1))          # NLC -> NCL
    # TODO(synk): at realistic h_dim, pad channel dims to 128 lanes and use
    # bf16 matmul operands (f32 accumulate) for lane-dense MXU/VST utilization.


# ----------------------------------------------------------------------------
# Deterministic parameter init (PyTorch-style uniform(+-1/sqrt(fan_in)))
# ----------------------------------------------------------------------------
def init_params(key, in_dim, h_dim, res_h_dim):
    def u(k, shape, fan_in):
        bound = 1.0 / float(np.sqrt(fan_in))
        return jax.random.uniform(k, shape, jnp.float32, -bound, bound)

    ks = jax.random.split(key, 8)
    p = {}
    p["w1"] = u(ks[0], (4, in_dim, h_dim // 2), in_dim * 4)
    p["b1"] = u(ks[1], (h_dim // 2,), in_dim * 4)
    p["w2"] = u(ks[2], (4, h_dim // 2, h_dim), (h_dim // 2) * 4)
    p["b2"] = u(ks[3], (h_dim,), (h_dim // 2) * 4)
    p["w3"] = u(ks[4], (3, h_dim, h_dim), h_dim * 3)
    p["b3"] = u(ks[5], (h_dim,), h_dim * 3)
    p["wr3"] = u(ks[6], (3, h_dim, res_h_dim), h_dim * 3)   # bias=False
    p["wr1"] = u(ks[7], (1, res_h_dim, h_dim), res_h_dim)   # bias=False
    return p


# ----------------------------------------------------------------------------
# Pure-JAX reference (for correctness check)
# ----------------------------------------------------------------------------
def _conv1d_ref(x_nlc, w, b, stride, padding):
    out = jax.lax.conv_general_dilated(
        x_nlc, w, window_strides=(stride,), padding=[(padding, padding)],
        dimension_numbers=("NWC", "WIO", "NWC"))
    return out + b.reshape(1, 1, -1)


def encoder_ref(x_ncl, params, n_res_layers):
    x = jnp.transpose(x_ncl, (0, 2, 1))
    x = jax.nn.relu(_conv1d_ref(x, params["w1"], params["b1"], 2, 1))
    x = jax.nn.relu(_conv1d_ref(x, params["w2"], params["b2"], 2, 1))
    x = _conv1d_ref(x, params["w3"], params["b3"], 1, 1)
    for _ in range(n_res_layers):
        h = jax.nn.relu(x)
        h = jax.lax.conv_general_dilated(h, params["wr3"], (1,), [(1, 1)],
                                         dimension_numbers=("NWC", "WIO", "NWC"))
        h = jax.nn.relu(h)
        h = jax.lax.conv_general_dilated(h, params["wr1"], (1,), [(0, 0)],
                                         dimension_numbers=("NWC", "WIO", "NWC"))
        x = x + h
    x = jax.nn.relu(x)
    return jnp.transpose(x, (0, 2, 1))


if __name__ == "__main__":
    B, in_dim, L = 2, 4, 16
    h_dim, res_h_dim, n_res_layers = 32, 8, 2

    key = jax.random.PRNGKey(0)
    kx, kp = jax.random.split(key)
    x = jax.random.normal(kx, (B, in_dim, L), jnp.float32)   # NCL like PyTorch
    params = init_params(kp, in_dim, h_dim, res_h_dim)

    fwd = jax.jit(lambda xx, pp: encoder_forward(xx, pp, n_res_layers=n_res_layers))
    out = jax.block_until_ready(fwd(x, params))

    ref = encoder_ref(x, params, n_res_layers)
    assert out.shape == (B, h_dim, 4), out.shape            # 16 -> 8 -> 4 -> 4
    np.testing.assert_allclose(np.asarray(out), np.asarray(ref),
                               rtol=1e-4, atol=1e-4)
    print("KERNEL_OK")
</pallas_src>

<mosaic_0001>
module attributes {stable_mosaic.version = 11 : i64} {
  func.func @_encoder_kernel(%arg0: i32, %arg1: memref<1x16x4xf32, #tpu.memory_space<vmem>>, %arg2: memref<16x16xf32, #tpu.memory_space<vmem>>, %arg3: memref<1x16xf32, #tpu.memory_space<vmem>>, %arg4: memref<64x32xf32, #tpu.memory_space<vmem>>, %arg5: memref<1x32xf32, #tpu.memory_space<vmem>>, %arg6: memref<96x32xf32, #tpu.memory_space<vmem>>, %arg7: memref<1x32xf32, #tpu.memory_space<vmem>>, %arg8: memref<96x8xf32, #tpu.memory_space<vmem>>, %arg9: memref<8x32xf32, #tpu.memory_space<vmem>>, %arg10: memref<1x4x32xf32, #tpu.memory_space<vmem>>, %arg11: memref<18x4xf32, #tpu.memory_space<vmem>>, %arg12: memref<10x16xf32, #tpu.memory_space<vmem>>, %arg13: memref<6x32xf32, #tpu.memory_space<vmem>>) attributes {dimension_semantics = [#tpu.dimension_semantics<parallel>], iteration_bounds = array<i64: 2>, scalar_prefetch = 0 : i64, scratch_operands = 3 : i64, tpu.core_type = #tpu.core_type<tc>, window_params = [{transform_indices = @transform_0, window_bounds = array<i64: 1, 16, 4>}, {pipeline_mode = #tpu.pipeline_mode<synchronous>, transform_indices = @transform_1, window_bounds = array<i64: 16, 16>}, {pipeline_mode = #tpu.pipeline_mode<synchronous>, transform_indices = @transform_2, window_bounds = array<i64: 1, 16>}, {pipeline_mode = #tpu.pipeline_mode<synchronous>, transform_indices = @transform_3, window_bounds = array<i64: 64, 32>}, {pipeline_mode = #tpu.pipeline_mode<synchronous>, transform_indices = @transform_4, window_bounds = array<i64: 1, 32>}, {pipeline_mode = #tpu.pipeline_mode<synchronous>, transform_indices = @transform_5, window_bounds = array<i64: 96, 32>}, {pipeline_mode = #tpu.pipeline_mode<synchronous>, transform_indices = @transform_6, window_bounds = array<i64: 1, 32>}, {pipeline_mode = #tpu.pipeline_mode<synchronous>, transform_indices = @transform_7, window_bounds = array<i64: 96, 8>}, {pipeline_mode = #tpu.pipeline_mode<synchronous>, transform_indices = @transform_8, window_bounds = array<i64: 8, 32>}, {transform_indices = @transform_9, window_bounds = array<i64: 1, 4, 32>}]} {
    %cst = arith.constant 0.000000e+00 : f32
    %0 = vector.broadcast %cst : f32 to vector<18x4xf32>
    %c0 = arith.constant 0 : index
    %c0_0 = arith.constant 0 : index
    %1 = vector.load %arg11[%c0, %c0_0] : memref<18x4xf32, #tpu.memory_space<vmem>>, vector<18x4xf32>
    tpu.vector_store %arg11[%c0, %c0_0], %0 {strides = array<i32>} : memref<18x4xf32, #tpu.memory_space<vmem>>, vector<18x4xf32>,
    %cst_1 = arith.constant 0.000000e+00 : f32
    %2 = vector.broadcast %cst_1 : f32 to vector<10x16xf32>
    %c0_2 = arith.constant 0 : index
    %c0_3 = arith.constant 0 : index
    %3 = vector.load %arg12[%c0_2, %c0_3] : memref<10x16xf32, #tpu.memory_space<vmem>>, vector<10x16xf32>
    tpu.vector_store %arg12[%c0_2, %c0_3], %2 {strides = array<i32>} : memref<10x16xf32, #tpu.memory_space<vmem>>, vector<10x16xf32>,
    %cst_4 = arith.constant 0.000000e+00 : f32
    %4 = vector.broadcast %cst_4 : f32 to vector<6x32xf32>
    %c0_5 = arith.constant 0 : index
    %c0_6 = arith.constant 0 : index
    %5 = vector.load %arg13[%c0_5, %c0_6] : memref<6x32xf32, #tpu.memory_space<vmem>>, vector<6x32xf32>
    tpu.vector_store %arg13[%c0_5, %c0_6], %4 {strides = array<i32>} : memref<6x32xf32, #tpu.memory_space<vmem>>, vector<6x32xf32>,
    %c0_7 = arith.constant 0 : index
    %c0_8 = arith.constant 0 : index
    %c0_9 = arith.constant 0 : index
    %6 = vector.load %arg1[%c0_7, %c0_8, %c0_9] : memref<1x16x4xf32, #tpu.memory_space<vmem>>, vector<1x16x4xf32>
    %7 = vector.shape_cast %6 : vector<1x16x4xf32> to vector<16x4xf32>
    %c1 = arith.constant 1 : index
    %c0_10 = arith.constant 0 : index
    %8 = vector.load %arg11[%c1, %c0_10] : memref<18x4xf32, #tpu.memory_space<vmem>>, vector<16x4xf32>
    tpu.vector_store %arg11[%c1, %c0_10], %7 {strides = array<i32>} : memref<18x4xf32, #tpu.memory_space<vmem>>, vector<16x4xf32>,
    %9 = tpu.iota {dimensions = array<i32: 0>} : vector<8x15xi32>
    %10 = tpu.iota {dimensions = array<i32: 1>} : vector<8x15xi32>
    %c2_i32 = arith.constant 2 : i32
    %11 = vector.broadcast %c2_i32 : i32 to vector<8x15xi32>
    %12 = arith.muli %11, %9 : vector<8x15xi32>
    %13 = arith.cmpi eq, %10, %12 : vector<8x15xi32>
    %14 = arith.extui %13 : vector<8x15xi1> to vector<8x15xi32>
    %15 = arith.sitofp %14 : vector<8x15xi32> to vector<8x15xf32>
    %c0_11 = arith.constant 0 : index
    %c0_12 = arith.constant 0 : index
    %16 = vector.load %arg11[%c0_11, %c0_12] : memref<18x4xf32, #tpu.memory_space<vmem>>, vector<15x4xf32>
    %c1_13 = arith.constant 1 : index
    %c0_14 = arith.constant 0 : index
    %17 = vector.load %arg11[%c1_13, %c0_14] : memref<18x4xf32, #tpu.memory_space<vmem>>, vector<15x4xf32>
    %c2 = arith.constant 2 : index
    %c0_15 = arith.constant 0 : index
    %18 = vector.load %arg11[%c2, %c0_15] : memref<18x4xf32, #tpu.memory_space<vmem>>, vector<15x4xf32>
    %c3 = arith.constant 3 : index
    %c0_16 = arith.constant 0 : index
    %19 = vector.load %arg11[%c3, %c0_16] : memref<18x4xf32, #tpu.memory_space<vmem>>, vector<15x4xf32>
    %20 = tpu.concatenate %16, %17, %18, %19 in 1 : vector<15x4xf32>, vector<15x4xf32>, vector<15x4xf32>, vector<15x4xf32> -> vector<15x16xf32>
    %cst_17 = arith.constant dense<0.000000e+00> : vector<8x16xf32>
    %21 = tpu.matmul %15, %20, %cst_17 {dimension_numbers = #tpu.dot_dimension_numbers<[1], [0], [0], [1], [0, 0, 1, 1], [], []>} : vector<8x15xf32>, vector<15x16xf32>, vector<8x16xf32> -> vector<8x16xf32>
    %c0_18 = arith.constant 0 : index
    %c0_19 = arith.constant 0 : index
    %22 = vector.load %arg2[%c0_18, %c0_19] : memref<16x16xf32, #tpu.memory_space<vmem>>, vector<16x16xf32>
    %cst_20 = arith.constant dense<0.000000e+00> : vector<8x16xf32>
    %23 = tpu.matmul %21, %22, %cst_20 {dimension_numbers = #tpu.dot_dimension_numbers<[1], [0], [0], [1], [0, 0, 1, 1], [], []>} : vector<8x16xf32>, vector<16x16xf32>, vector<8x16xf32> -> vector<8x16xf32>
    %c0_21 = arith.constant 0 : index
    %c0_22 = arith.constant 0 : index
    %24 = vector.load %arg3[%c0_21, %c0_22] : memref<1x16xf32, #tpu.memory_space<vmem>>, vector<1x16xf32>
    %25 = vector.broadcast %24 : vector<1x16xf32> to vector<8x16xf32>
    %26 = arith.addf %23, %25 : vector<8x16xf32>
    %cst_23 = arith.constant 0.000000e+00 : f32
    %27 = vector.broadcast %cst_23 : f32 to vector<8x16xf32>
    %28 = arith.maximumf %26, %27 : vector<8x16xf32>
    %c1_24 = arith.constant 1 : index
    %c0_25 = arith.constant 0 : index
    %29 = vector.load %arg12[%c1_24, %c0_25] : memref<10x16xf32, #tpu.memory_space<vmem>>, vector<8x16xf32>
    tpu.vector_store %arg12[%c1_24, %c0_25], %28 {strides = array<i32>} : memref<10x16xf32, #tpu.memory_space<vmem>>, vector<8x16xf32>,
    %30 = tpu.iota {dimensions = array<i32: 0>} : vector<4x7xi32>
    %31 = tpu.iota {dimensions = array<i32: 1>} : vector<4x7xi32>
    %c2_i32_26 = arith.constant 2 : i32
    %32 = vector.broadcast %c2_i32_26 : i32 to vector<4x7xi32>
    %33 = arith.muli %32, %30 : vector<4x7xi32>
    %34 = arith.cmpi eq, %31, %33 : vector<4x7xi32>
    %35 = arith.extui %34 : vector<4x7xi1> to vector<4x7xi32>
    %36 = arith.sitofp %35 : vector<4x7xi32> to vector<4x7xf32>
    %c0_27 = arith.constant 0 : index
    %c0_28 = arith.constant 0 : index
    %37 = vector.load %arg12[%c0_27, %c0_28] : memref<10x16xf32, #tpu.memory_space<vmem>>, vector<7x16xf32>
    %c1_29 = arith.constant 1 : index
    %c0_30 = arith.constant 0 : index
    %38 = vector.load %arg12[%c1_29, %c0_30] : memref<10x16xf32, #tpu.memory_space<vmem>>, vector<7x16xf32>
    %c2_31 = arith.constant 2 : index
    %c0_32 = arith.constant 0 : index
    %39 = vector.load %arg12[%c2_31, %c0_32] : memref<10x16xf32, #tpu.memory_space<vmem>>, vector<7x16xf32>
    %c3_33 = arith.constant 3 : index
    %c0_34 = arith.constant 0 : index
    %40 = vector.load %arg12[%c3_33, %c0_34] : memref<10x16xf32, #tpu.memory_space<vmem>>, vector<7x16xf32>
    %41 = tpu.concatenate %37, %38, %39, %40 in 1 : vector<7x16xf32>, vector<7x16xf32>, vector<7x16xf32>, vector<7x16xf32> -> vector<7x64xf32>
    %cst_35 = arith.constant dense<0.000000e+00> : vector<4x64xf32>
    %42 = tpu.matmul %36, %41, %cst_35 {dimension_numbers = #tpu.dot_dimension_numbers<[1], [0], [0], [1], [0, 0, 1, 1], [], []>} : vector<4x7xf32>, vector<7x64xf32>, vector<4x64xf32> -> vector<4x64xf32>
    %c0_36 = arith.constant 0 : index
    %c0_37 = arith.constant 0 : index
    %43 = vector.load %arg4[%c0_36, %c0_37] : memref<64x32xf32, #tpu.memory_space<vmem>>, vector<64x32xf32>
    %cst_38 = arith.constant dense<0.000000e+00> : vector<4x32xf32>
    %44 = tpu.matmul %42, %43, %cst_38 {dimension_numbers = #tpu.dot_dimension_numbers<[1], [0], [0], [1], [0, 0, 1, 1], [], []>} : vector<4x64xf32>, vector<64x32xf32>, vector<4x32xf32> -> vector<4x32xf32>
    %c0_39 = arith.constant 0 : index
    %c0_40 = arith.constant 0 : index
    %45 = vector.load %arg5[%c0_39, %c0_40] : memref<1x32xf32, #tpu.memory_space<vmem>>, vector<1x32xf32>
    %46 = vector.broadcast %45 : vector<1x32xf32> to vector<4x32xf32>
    %47 = arith.addf %44, %46 : vector<4x32xf32>
    %cst_41 = arith.constant 0.000000e+00 : f32
    %48 = vector.broadcast %cst_41 : f32 to vector<4x32xf32>
    %49 = arith.maximumf %47, %48 : vector<4x32xf32>
    %c1_42 = arith.constant 1 : index
    %c0_43 = arith.constant 0 : index
    %50 = vector.load %arg13[%c1_42, %c0_43] : memref<6x32xf32, #tpu.memory_space<vmem>>, vector<4x32xf32>
    tpu.vector_store %arg13[%c1_42, %c0_43], %49 {strides = array<i32>} : memref<6x32xf32, #tpu.memory_space<vmem>>, vector<4x32xf32>,
    %c0_44 = arith.constant 0 : index
    %c0_45 = arith.constant 0 : index
    %51 = vector.load %arg13[%c0_44, %c0_45] : memref<6x32xf32, #tpu.memory_space<vmem>>, vector<4x32xf32>
    %c1_46 = arith.constant 1 : index
    %c0_47 = arith.constant 0 : index
    %52 = vector.load %arg13[%c1_46, %c0_47] : memref<6x32xf32, #tpu.memory_space<vmem>>, vector<4x32xf32>
    %c2_48 = arith.constant 2 : index
    %c0_49 = arith.constant 0 : index
    %53 = vector.load %arg13[%c2_48, %c0_49] : memref<6x32xf32, #tpu.memory_space<vmem>>, vector<4x32xf32>
    %54 = tpu.concatenate %51, %52, %53 in 1 : vector<4x32xf32>, vector<4x32xf32>, vector<4x32xf32> -> vector<4x96xf32>
    %c0_50 = arith.constant 0 : index
    %c0_51 = arith.constant 0 : index
    %55 = vector.load %arg6[%c0_50, %c0_51] : memref<96x32xf32, #tpu.memory_space<vmem>>, vector<96x32xf32>
    %cst_52 = arith.constant dense<0.000000e+00> : vector<4x32xf32>
    %56 = tpu.matmul %54, %55, %cst_52 {dimension_numbers = #tpu.dot_dimension_numbers<[1], [0], [0], [1], [0, 0, 1, 1], [], []>} : vector<4x96xf32>, vector<96x32xf32>, vector<4x32xf32> -> vector<4x32xf32>
    %c0_53 = arith.constant 0 : index
    %c0_54 = arith.constant 0 : index
    %57 = vector.load %arg7[%c0_53, %c0_54] : memref<1x32xf32, #tpu.memory_space<vmem>>, vector<1x32xf32>
    %58 = vector.broadcast %57 : vector<1x32xf32> to vector<4x32xf32>
    %59 = arith.addf %56, %58 : vector<4x32xf32>
    %cst_55 = arith.constant 0.000000e+00 : f32
    %60 = vector.broadcast %cst_55 : f32 to vector<4x32xf32>
    %61 = arith.maximumf %59, %60 : vector<4x32xf32>
    %c1_56 = arith.constant 1 : index
    %c0_57 = arith.constant 0 : index
    %62 = vector.load %arg13[%c1_56, %c0_57] : memref<6x32xf32, #tpu.memory_space<vmem>>, vector<4x32xf32>
    tpu.vector_store %arg13[%c1_56, %c0_57], %61 {strides = array<i32>} : memref<6x32xf32, #tpu.memory_space<vmem>>, vector<4x32xf32>,
    %c0_58 = arith.constant 0 : index
    %c0_59 = arith.constant 0 : index
    %63 = vector.load %arg13[%c0_58, %c0_59] : memref<6x32xf32, #tpu.memory_space<vmem>>, vector<4x32xf32>
    %c1_60 = arith.constant 1 : index
    %c0_61 = arith.constant 0 : index
    %64 = vector.load %arg13[%c1_60, %c0_61] : memref<6x32xf32, #tpu.memory_space<vmem>>, vector<4x32xf32>
    %c2_62 = arith.constant 2 : index
    %c0_63 = arith.constant 0 : index
    %65 = vector.load %arg13[%c2_62, %c0_63] : memref<6x32xf32, #tpu.memory_space<vmem>>, vector<4x32xf32>
    %66 = tpu.concatenate %63, %64, %65 in 1 : vector<4x32xf32>, vector<4x32xf32>, vector<4x32xf32> -> vector<4x96xf32>
    %c0_64 = arith.constant 0 : index
    %c0_65 = arith.constant 0 : index
    %67 = vector.load %arg8[%c0_64, %c0_65] : memref<96x8xf32, #tpu.memory_space<vmem>>, vector<96x8xf32>
    %cst_66 = arith.constant dense<0.000000e+00> : vector<4x8xf32>
    %68 = tpu.matmul %66, %67, %cst_66 {dimension_numbers = #tpu.dot_dimension_numbers<[1], [0], [0], [1], [0, 0, 1, 1], [], []>} : vector<4x96xf32>, vector<96x8xf32>, vector<4x8xf32> -> vector<4x8xf32>
    %cst_67 = arith.constant 0.000000e+00 : f32
    %69 = vector.broadcast %cst_67 : f32 to vector<4x8xf32>
    %70 = arith.maximumf %68, %69 : vector<4x8xf32>
    %c0_68 = arith.constant 0 : index
    %c0_69 = arith.constant 0 : index
    %71 = vector.load %arg9[%c0_68, %c0_69] : memref<8x32xf32, #tpu.memory_space<vmem>>, vector<8x32xf32>
    %cst_70 = arith.constant dense<0.000000e+00> : vector<4x32xf32>
    %72 = tpu.matmul %70, %71, %cst_70 {dimension_numbers = #tpu.dot_dimension_numbers<[1], [0], [0], [1], [0, 0, 1, 1], [], []>} : vector<4x8xf32>, vector<8x32xf32>, vector<4x32xf32> -> vector<4x32xf32>
    %73 = arith.addf %59, %72 : vector<4x32xf32>
    %cst_71 = arith.constant 0.000000e+00 : f32
    %74 = vector.broadcast %cst_71 : f32 to vector<4x32xf32>
    %75 = arith.maximumf %73, %74 : vector<4x32xf32>
    %c1_72 = arith.constant 1 : index
    %c0_73 = arith.constant 0 : index
    %76 = vector.load %arg13[%c1_72, %c0_73] : memref<6x32xf32, #tpu.memory_space<vmem>>, vector<4x32xf32>
    tpu.vector_store %arg13[%c1_72, %c0_73], %75 {strides = array<i32>} : memref<6x32xf32, #tpu.memory_space<vmem>>, vector<4x32xf32>,
    %c0_74 = arith.constant 0 : index
    %c0_75 = arith.constant 0 : index
    %77 = vector.load %arg13[%c0_74, %c0_75] : memref<6x32xf32, #tpu.memory_space<vmem>>, vector<4x32xf32>
    %c1_76 = arith.constant 1 : index
    %c0_77 = arith.constant 0 : index
    %78 = vector.load %arg13[%c1_76, %c0_77] : memref<6x32xf32, #tpu.memory_space<vmem>>, vector<4x32xf32>
    %c2_78 = arith.constant 2 : index
    %c0_79 = arith.constant 0 : index
    %79 = vector.load %arg13[%c2_78, %c0_79] : memref<6x32xf32, #tpu.memory_space<vmem>>, vector<4x32xf32>
    %80 = tpu.concatenate %77, %78, %79 in 1 : vector<4x32xf32>, vector<4x32xf32>, vector<4x32xf32> -> vector<4x96xf32>
    %c0_80 = arith.constant 0 : index
    %c0_81 = arith.constant 0 : index
    %81 = vector.load %arg8[%c0_80, %c0_81] : memref<96x8xf32, #tpu.memory_space<vmem>>, vector<96x8xf32>
    %cst_82 = arith.constant dense<0.000000e+00> : vector<4x8xf32>
    %82 = tpu.matmul %80, %81, %cst_82 {dimension_numbers = #tpu.dot_dimension_numbers<[1], [0], [0], [1], [0, 0, 1, 1], [], []>} : vector<4x96xf32>, vector<96x8xf32>, vector<4x8xf32> -> vector<4x8xf32>
    %cst_83 = arith.constant 0.000000e+00 : f32
    %83 = vector.broadcast %cst_83 : f32 to vector<4x8xf32>
    %84 = arith.maximumf %82, %83 : vector<4x8xf32>
    %c0_84 = arith.constant 0 : index
    %c0_85 = arith.constant 0 : index
    %85 = vector.load %arg9[%c0_84, %c0_85] : memref<8x32xf32, #tpu.memory_space<vmem>>, vector<8x32xf32>
    %cst_86 = arith.constant dense<0.000000e+00> : vector<4x32xf32>
    %86 = tpu.matmul %84, %85, %cst_86 {dimension_numbers = #tpu.dot_dimension_numbers<[1], [0], [0], [1], [0, 0, 1, 1], [], []>} : vector<4x8xf32>, vector<8x32xf32>, vector<4x32xf32> -> vector<4x32xf32>
    %87 = arith.addf %73, %86 : vector<4x32xf32>
    %cst_87 = arith.constant 0.000000e+00 : f32
    %88 = vector.broadcast %cst_87 : f32 to vector<4x32xf32>
    %89 = arith.maximumf %87, %88 : vector<4x32xf32>
    %c0_88 = arith.constant 0 : index
    %c0_89 = arith.constant 0 : index
    %c0_90 = arith.constant 0 : index
    %90 = vector.load %arg10[%c0_88, %c0_89, %c0_90] : memref<1x4x32xf32, #tpu.memory_space<vmem>>, vector<1x4x32xf32>
    %91 = vector.shape_cast %90 : vector<1x4x32xf32> to vector<4x32xf32>
    %92 = vector.shape_cast %89 : vector<4x32xf32> to vector<1x4x32xf32>
    tpu.vector_store %arg10[%c0_88, %c0_89, %c0_90], %92 {strides = array<i32>} : memref<1x4x32xf32, #tpu.memory_space<vmem>>, vector<1x4x32xf32>,
    return
  }
  func.func @transform_0(%arg0: i32) -> (i32, i32, i32) {
    %c0_i32 = arith.constant 0 : i32
    %c0_i32_0 = arith.constant 0 : i32
    %c0_i32_1 = arith.constant 0 : i32
    return %arg0, %c0_i32, %c0_i32_0 : i32, i32, i32
  }
  func.func @transform_1(%arg0: i32) -> (i32, i32) {
    %c0_i32 = arith.constant 0 : i32
    %c0_i32_0 = arith.constant 0 : i32
    %c0_i32_1 = arith.constant 0 : i32
    return %c0_i32, %c0_i32_0 : i32, i32
  }
  func.func @transform_2(%arg0: i32) -> (i32, i32) {
    %c0_i32 = arith.constant 0 : i32
    %c0_i32_0 = arith.constant 0 : i32
    %c0_i32_1 = arith.constant 0 : i32
    return %c0_i32, %c0_i32_0 : i32, i32
  }
  func.func @transform_3(%arg0: i32) -> (i32, i32) {
    %c0_i32 = arith.constant 0 : i32
    %c0_i32_0 = arith.constant 0 : i32
    %c0_i32_1 = arith.constant 0 : i32
    return %c0_i32, %c0_i32_0 : i32, i32
  }
  func.func @transform_4(%arg0: i32) -> (i32, i32) {
    %c0_i32 = arith.constant 0 : i32
    %c0_i32_0 = arith.constant 0 : i32
    %c0_i32_1 = arith.constant 0 : i32
    return %c0_i32, %c0_i32_0 : i32, i32
  }
  func.func @transform_5(%arg0: i32) -> (i32, i32) {
    %c0_i32 = arith.constant 0 : i32
    %c0_i32_0 = arith.constant 0 : i32
    %c0_i32_1 = arith.constant 0 : i32
    return %c0_i32, %c0_i32_0 : i32, i32
  }
  func.func @transform_6(%arg0: i32) -> (i32, i32) {
    %c0_i32 = arith.constant 0 : i32
    %c0_i32_0 = arith.constant 0 : i32
    %c0_i32_1 = arith.constant 0 : i32
    return %c0_i32, %c0_i32_0 : i32, i32
  }
  func.func @transform_7(%arg0: i32) -> (i32, i32) {
    %c0_i32 = arith.constant 0 : i32
    %c0_i32_0 = arith.constant 0 : i32
    %c0_i32_1 = arith.constant 0 : i32
    return %c0_i32, %c0_i32_0 : i32, i32
  }
  func.func @transform_8(%arg0: i32) -> (i32, i32) {
    %c0_i32 = arith.constant 0 : i32
    %c0_i32_0 = arith.constant 0 : i32
    %c0_i32_1 = arith.constant 0 : i32
    return %c0_i32, %c0_i32_0 : i32, i32
  }
  func.func @transform_9(%arg0: i32) -> (i32, i32, i32) {
    %c0_i32 = arith.constant 0 : i32
    %c0_i32_0 = arith.constant 0 : i32
    %c0_i32_1 = arith.constant 0 : i32
    return %arg0, %c0_i32, %c0_i32_0 : i32, i32, i32
  }
}

</mosaic_0001>

<bundles_post_ra>
// kernel: _lambda_.1
= control target key start
LH: loop header
LB: loop body
LE: loop exit
PB: predicated region body
PF: predicated region fallthrough
CT: control target
= control target key end

     0   :  { %14 = vsyncpa [#allocation6], 0  ;;  %s2268_s0 = inlined_call_operand.vmem [shape: f32[2,16,4], index: 0, kind: input, shape index: {}]   ;;  %s2269_s1 = inlined_call_operand.vmem [shape: f32[16,16], index: 1, kind: input, shape index: {}]   ;;  %s2270_s2 = inlined_call_operand.vmem [shape: f32[1,16], index: 2, kind: input, shape index: {}]   ;;  %s2271_s3 = inlined_call_operand.vmem [shape: f32[64,32], index: 3, kind: input, shape index: {}]   ;;  %s2272_s4 = inlined_call_operand.hbm [shape: f32[1,32], index: 4, kind: input, shape index: {}]   ;;  %s2273_s5 = inlined_call_operand.vmem [shape: f32[96,32], index: 5, kind: input, shape index: {}]   ;;  %s2274_s6 = inlined_call_operand.hbm [shape: f32[1,32], index: 6, kind: input, shape index: {}]   ;;  %s2275_s7 = inlined_call_operand.vmem [shape: f32[96,8], index: 7, kind: input, shape index: {}]   ;;  %s2276_s8 = inlined_call_operand.vmem [shape: f32[8,32], index: 8, kind: input, shape index: {}]   ;;  %s2277_s9 = inlined_call_operand.hbm [shape: f32[2,4,32], index: 9, kind: output, shape index: {}]  }
   0x1   :  { %15 = vsyncpa [#allocation9], 0 }
   0x2   :  { %16 = vsyncpa [#allocation7], 0 }
   0x3   :  { %18 = vsyncpa [#allocation7 + $0x1], 0  ;;  %s1897_s30 = smov 0   ;;  %s1899_s10 = smov 0  }
   0x4   :  { %s1901_s11 = smov 0   ;;  %s1903_s12 = smov 0  }
   0x5 LB: > { %s1918_s13 = sadd.s32 4294967295, %s1831_s12   ;;  %s1326_s14 = sadd.s32 4294967294, %s1831_s12   ;;  %s1831_s12 = sphi %s1903_s12, %s2297_s12   ;;  %s1827_s11 = sphi %s1901_s11, %s2296_s11   ;;  %s1823_s10 = sphi %s1899_s10, %s2295_s10   ;;  %s1819_s30 = sphi %s1897_s30, %s2294_s30  }
   0x6   : > { %s1922_s15 = sadd.s32 1, %s1831_s12   ;;  %s225_s16 = sadd.s32 1, %s1827_s11 }
   0x7   : > { %s222_s17 = ssub.s32 %s1831_s12, %s1922_s15  ;;  %p235_p0 = scmp.ne.s32.totalorder %s1827_s11, %s1823_s10 }
   0x8   : > { %p223_p1 = scmp.eq.s32.totalorder %s222_s17, 0  ;;  %p236_p2 = scmp.eq.s32.totalorder %s1918_s13, 1 }
   0x9   : > { %p241_p3 = scmp.ne.s32.totalorder %s1823_s10, %s1819_s30  ;;  %p242_p4 = scmp.eq.s32.totalorder %s1326_s14, 1 }
   0xa   : > { %s1933_s18 = scalar_select %p223_p1, %s1827_s11, %s225_s16  }
   0xb   : > { %p1935_p5 = por %p236_p2, %p235_p0  ;;  %p1939_p6 = por %p242_p4, %p241_p3 }
   0xc   : > { %2281 = sst [smem:[#allocation14_spill]] %s1933_s18  ;;  %p1327_p7 = scmp.ge.s32.totalorder %s1831_s12, 1 }
   0xd   : > { %s2282_s19 = scalar_select %p1935_p5, 1, 0 }
   0xe   : > { %s2283_s20 = scalar_select %p1939_p6, 1, 0 }
   0xf   : > { %p249_p8 = scmp.lt.s32.totalorder %s1831_s12, 3  ;;  %p2278_p9 = scmp.eq.s32.totalorder %s1918_s13, 0 }
  0x10   : > { %s1833_s22 = smov [#allocation5]   ;;  %s1834_s24 = smov [#allocation8]  }
  0x11   : > { %p1946_p10 = pnand %p1327_p7, %p249_p8  ;;  %s271_s23 = sshll.u32 %s1833_s22, 4  ;;  %s272_s23 = int_to_ptr.vmem [resolvable:$true] %s271_s23 }
  0x12   : > { %s285_s25 = sshll.u32 %s1834_s24, 4  ;;  %s1705_s29 = scalar_lea.hbm %s2272_s4, 16  ;;  %s1958_s25 = int_to_ptr.vmem [resolvable:$true] %s285_s25 }
  0x13   : > { %s2284_s21 = scalar_select %p1946_p10, 1, 0 }
  0x14   : > { %p1629_p11 = pneg %p1946_p10  ;;  %p1706_p13 = scmp.ne.s32.totalorder %s2272_s4, %s1705_s29 }
  0x15   : > { %p1712_p3 = scmp.lt.u32.totalorder %s1705_s29, %s2272_s4 }
  0x16   : > { %p1954_p12 = pnand %p2278_p9, %p1629_p11 }
  0x18   : > { %p1707_p0 = pneg %p1954_p12 }
  0x1a   : > { %p1708_p1 = pnand %p1707_p0, %p1706_p13 }
  0x1c   : > { %p1709_p2 = pneg %p1708_p1 }
  0x1e   : > { %p1714_p4 = pnand %p1712_p3, %p1709_p2 }
  0x20   : > { %1717 = shalt.err (!%p1714_p4)
}
  0x21   : > { %s1718_s24 = scalar_lea.vmem %s272_s23, 16  ;;  %s1725_s27 = scalar_lea.vmem %s272_s23, 32 }
  0x22   : > { %p1719_p7 = scmp.ne.s32.totalorder %s272_s23, %s1718_s24  ;;  %p1726_p9 = scmp.lt.s32.totalorder %s272_s23, %s272_s23 }
  0x23   : > { %p1727_p6 = scmp.lt.s32.totalorder %s1725_s27, %s1718_s24 }
  0x24   : > { %p1721_p8 = pnand %p1719_p7, %p1707_p0 }
  0x25   : > { %p1728_p5 = por %p1727_p6, %p1726_p9 }
  0x26   : > { %p1722_p11 = pneg %p1721_p8 }
  0x28   : > { %p1729_p10 = pnand %p1728_p5, %p1722_p11 }
  0x2a   : > { %1732 = shalt.err (!%p1729_p10)
}
  0x2b   : > { %1632 = dma.hbm_to_vmem [thread:$0]  (!%p1954_p12), %s2272_s4, 16, %s272_s23, [#allocation6]  }
  0x2c   : > { %s1733_s17 = scalar_lea.hbm %s2274_s6, 16 }
  0x2d   : > { %p1734_p13 = scmp.ne.s32.totalorder %s2274_s6, %s1733_s17  ;;  %p1740_p9 = scmp.lt.u32.totalorder %s1733_s17, %s2274_s6 }
  0x2f   : > { %p1736_p6 = pnand %p1734_p13, %p1707_p0 }
  0x31   : > { %p1737_p5 = pneg %p1736_p6 }
  0x33   : > { %p1742_p10 = pnand %p1740_p9, %p1737_p5 }
  0x35   : > { %1745 = shalt.err (!%p1742_p10)
}
  0x36   : > { %s1746_s23 = scalar_lea.vmem %s1958_s25, 16  ;;  %s1753_s18 = scalar_lea.vmem %s1958_s25, 32 }
  0x37   : > { %p1747_p1 = scmp.ne.s32.totalorder %s1958_s25, %s1746_s23  ;;  %p1754_p4 = scmp.lt.s32.totalorder %s1958_s25, %s1958_s25 }
  0x38   : > { %p1755_p7 = scmp.lt.s32.totalorder %s1753_s18, %s1746_s23 }
  0x39   : > { %p1749_p2 = pnand %p1747_p1, %p1707_p0 }
  0x3a   : > { %p1756_p8 = por %p1755_p7, %p1754_p4 }
  0x3b   : > { %p1750_p3 = pneg %p1749_p2 }
  0x3d   : > { %p1757_p11 = pnand %p1756_p8, %p1750_p3 }
  0x3f   : > { %1760 = shalt.err (!%p1757_p11)
}
  0x40   : > { %1635 = dma.hbm_to_vmem [thread:$0]  (!%p1954_p12), %s2274_s6, 16, %s1958_s25, [#allocation9]  }
  0x41   : > { %p2286_p13 = scmp.ne.s32.totalorder %s2284_s21, 0 }
  0x42   : > { %p2287_p0 = scmp.eq.s32.totalorder (!%p2286_p13), %s1918_s13, 0 }
  0x43   : > { %312 = sbr.rel (%p2286_p13) target bundleno = 2677 (0xa75), region = 56 }
  0x4a   : > { %1806 = dma.done.wait (%p2287_p0), [#allocation6], 16   ;;  %p2288_p6 = pmov %p2287_p0 }
  0x4b   : > { %p2289_p5 = pmov %p2287_p0 }
  0x4c   : > { %1808 = vsyncadd (%p2288_p6), [#allocation6], 4294967280 }
  0x4d   : > { %1810 = dma.done.wait (%p2289_p5), [#allocation9], 16   ;;  %p2290_p9 = pmov %p2287_p0 }
  0x4e   : > { %p352_p10 = scmp.lt.s32.totalorder %s1918_s13, 1  ;;  %vm357_vm0 = vcmask 31744   ;;  %vm360_vm1 = vcmask 25600   ;;  %v1835_v0 = vmov 0.0   ;;  %v1836_v3 = vmov 0.0|0.0   ;;  %s1838_s17 = smov 4  }
  0x4f   : > { %1812 = vsyncadd (%p2290_p9), [#allocation9], 4294967280  ;;  %358 = vst.msk [vmem:[#allocation2] sm:$0xff] %vm357_vm0, %v1835_v0  ;;  %1431 = vmatprep.subr.mxu0 %v1835_v0  ;;  %1546 = vmatprep.subr.bf16.mxu1 %v1836_v3  ;;  %vm1837_vm2 = vmmov 0   ;;  %s1839_s22 = smov 12   ;;  %s1840_s24 = smov 8   ;;  %v372_v13 = vlaneseq }
  0x50   : > { %359 = vst.msk [vmem:[#allocation2 + $0x8] sm:$0xff] %vm357_vm0, %v1835_v0  ;;  %s353_s21 = scalar_select %p352_p10, %s1918_s13, 1  ;;  %1421 = vmatprep.mubr.msk.f32.mxu1 %vm1837_vm2, %v1835_v0  ;;  %1433 = vmatprep.mubr.msk.f32.mxu0 %vm1837_vm2, %v1835_v0  ;;  %vm414_vm3 = vcmask 64512   ;;  %vm417_vm4 = vcmask 97280   ;;  %vm424_vm5 = vcmask 1046528   ;;  %vm1841_vm6 = vmmov 1  }
  0x51   : > { %361 = vst.msk [vmem:[#allocation2 + $0x10] sm:$0x3] %vm360_vm1, %v1835_v0  ;;  %v373_v15 = vshrl.u32 %v372_v13, 7  ;;  %v375_v24 = vand.u32 127, %v372_v13  ;;  %vm1548_vm7 = vmpackc.low %vm424_vm5, %vm1841_vm6  ;;  %v498_v34 = vld [vmem:[%s2269_s1] sm:$0xff]  ;;  %v499_v35 = vld [vmem:[%s2269_s1 + $0x8] sm:$0xff] }
  0x52   : > { %s1356_s25 = sshll.u32 %s353_s21, 4  ;;  %vm420_vm9 = vcmask 121856   ;;  %v1551_v38 = vpack.c.bf16 %v499_v35, %v498_v34  ;;  %vm362_vm10 = vcmask 130048   ;;  %vm364_vm11 = vcmask 123904   ;;  %v1340_v41 = vld [vmem:[%s2270_s2] ss:$0 sm:$0xff] }
  0x53   : > { %s356_s16 = scalar_lea.vmem %s2268_s0, %s1356_s25  ;;  %v376_v25 = vmul.u32 2, %v373_v15  ;;  %363 = vst.msk [vmem:[#allocation3] sm:$0xff] %vm362_vm10, %v1835_v0  ;;  %v679_v46 = vld [vmem:[%s2271_s3] sm:$0xff]  ;;  %v680_v47 = vld [vmem:[%s2271_s3 + $0x8] sm:$0xff]  ;;  %v681_v49 = vld [vmem:[%s2271_s3 + $0x10] sm:$0xff]  ;;  %s1842_s21 = smov 32  }
  0x54   : > { %v368_v1 = vld [vmem:[%s356_s16] sm:$0xff]  ;;  %v369_v2 = vld [vmem:[%s356_s16 + $0x8] sm:$0xff]  ;;  %365 = vst.msk [vmem:[#allocation3 + $0x8] sm:$0x3] %vm364_vm11, %v1835_v0  ;;  %v1554_v48 = vpack.c.bf16 %v680_v47, %v679_v46  ;;  %v682_v50 = vld [vmem:[%s2271_s3 + $0x18] sm:$0xff]  ;;  %s1843_s25 = smov 16  }
  0x55   : > { %370 = vst.msk [vmem:[#allocation2 + $0x1] sm:$0xff] %vm357_vm0, %v368_v1  ;;  %371 = vst.msk [vmem:[#allocation2 + $0x9] sm:$0xff] %vm357_vm0, %v369_v2  ;;  %vm377_vm8 = vcmp.eq.s32.totalorder %v375_v24, %v376_v25  ;;  %v1557_v51 = vpack.c.bf16 %v682_v50, %v681_v49  ;;  %v683_v52 = vld [vmem:[%s2271_s3 + $0x20] sm:$0xff]  ;;  %v684_v53 = vld [vmem:[%s2271_s3 + $0x28] sm:$0xff]  ;;  %vm599_vm12 = vcmask 261120   ;;  %vm601_vm13 = vcmask 392192  }
  0x56   : > { %v1337_v37 = vsel %vm377_vm8, 1.0, %v1835_v0  ;;  %v1560_v56 = vpack.c.bf16 %v684_v53, %v683_v52  ;;  %v685_v57 = vld [vmem:[%s2271_s3 + $0x30] sm:$0xff]  ;;  %v686_v58 = vld [vmem:[%s2271_s3 + $0x38] sm:$0xff]  ;;  %vm603_vm14 = vcmask 56320   ;;  %vm366_vm15 = vcmask 259072   ;;  %v789_v15 = vld [vmem:[%s2273_s5 + $0x28] sm:$0xff] }
  0x57   : > { %v1563_v60 = vpack.c.bf16 %v686_v58, %v685_v57  ;;  %367 = vst.msk [vmem:[#allocation4] sm:$0x3f] %vm366_vm15, %v1835_v0  ;;  %v795_v24 = vld [vmem:[%s2273_s5 + $0x58] sm:$0xff]  ;;  %vm769_vm1 = vcmask 257024   ;;  %v898_v47 = vld [vmem:[%s2275_s7 + $0x30] sm:$0xff]  ;;  %v900_v50 = vld [vmem:[%s2275_s7 + $0x40] sm:$0xff] }
  0x58   : > { %v902_v53 = vld [vmem:[%s2275_s7 + $0x50] sm:$0xff]  ;;  %s349_s14 = sand.u32 1, %s1823_s10   ;;  %p2291_p1 = scmp.ne.s32.totalorder %s2282_s19, 0 }
  0x5c   : > { %v382_v4 = vld [vmem:[#allocation2 + $0x1] sm:$0xff]  ;;  %v383_v5 = vld [vmem:[#allocation2 + $0x9] sm:$0x7f] }
  0x5d   : > { %v384_v6 = vld [vmem:[#allocation2 + $0x2] sm:$0xff]  ;;  %v1690_v7 = vpack.i.bf16 %v383_v5, %v382_v4  ;;  %v385_v8 = vld [vmem:[#allocation2 + $0xa] sm:$0x7f] }
  0x5e   : > { %v386_v9 = vld [vmem:[#allocation2 + $0x3] sm:$0xff]  ;;  %v387_v10 = vld [vmem:[#allocation2 + $0xb] sm:$0x7f]  ;;  %v1695_v12 = vpack.i.bf16 %v385_v8, %v384_v6 }
  0x5f   : > { %v1700_v11 = vpack.i.bf16 %v387_v10, %v386_v9  ;;  %1691 = vrot.lane.b32.xlu0 %v1690_v7, %s1838_s17  ;;  %v380_v19 = vld [vmem:[#allocation2] sm:$0xff]  ;;  %v381_v20 = vld [vmem:[#allocation2 + $0x8] sm:$0x7f]  ;;  %v786_v10 = vld [vmem:[%s2273_s5 + $0x10] sm:$0xff] }
  0x60   : > { %v784_v8 = vld [vmem:[%s2273_s5] sm:$0xff]  ;;  %v785_v9 = vld [vmem:[%s2273_s5 + $0x8] sm:$0xff] }
  0x61   : > { %1701 = vrot.lane.b32.xlu1 %v1700_v11, %s1839_s22  ;;  %s1844_s22 = smov 48   ;;  %v1566_v11 = vpack.c.bf16 %v785_v9, %v784_v8 }
  0x63   : > { %1696 = vrot.lane.b32.xlu0 %v1695_v12, %s1840_s24  ;;  %v787_v12 = vld [vmem:[%s2273_s5 + $0x18] sm:$0xff]  ;;  %s1845_s24 = smov 64  }
  0x64   : > { %v1569_v13 = vpack.c.bf16 %v787_v12, %v786_v10 }
  0xd1   : > { %v1692_v14 = vpop.permute.xlu0 %1691 }
  0xd2   : > { %v1694_v17 = vunpack.i.h.bf16 %v1692_v14  ;;  %v1693_v18 = vunpack.i.l.bf16 %v1692_v14  ;;  %v788_v14 = vld [vmem:[%s2273_s5 + $0x20] sm:$0xff] }
  0xd3   : > { %v1702_v16 = vpop.permute.xlu1 %1701 }
  0xd4   : > { %v1704_v22 = vunpack.i.h.bf16 %v1702_v16  ;;  %v1703_v23 = vunpack.i.l.bf16 %v1702_v16  ;;  %v412_v28 = vsel %vm357_vm0, %v380_v19, %v1693_v18  ;;  %v413_v29 = vsel %vm357_vm0, %v381_v20, %v1694_v17  ;;  %v790_v17 = vld [vmem:[%s2273_s5 + $0x30] sm:$0xff]  ;;  %v791_v18 = vld [vmem:[%s2273_s5 + $0x38] sm:$0xff]  ;;  %v792_v20 = vld [vmem:[%s2273_s5 + $0x40] sm:$0xff] }
  0xd5   : > { %v1697_v21 = vpop.permute.xlu0 %1696  ;;  %vm694_vm0 = vcmask 523264   ;;  %v1572_v16 = vpack.c.bf16 %v789_v15, %v788_v14  ;;  %v1575_v19 = vpack.c.bf16 %v791_v18, %v790_v17 }
  0xd6   : > { %v1699_v26 = vunpack.i.h.bf16 %v1697_v21  ;;  %v1698_v27 = vunpack.i.l.bf16 %v1697_v21  ;;  %v793_v21 = vld [vmem:[%s2273_s5 + $0x48] sm:$0xff] }
  0xd8   : > { %v415_v30 = vsel %vm414_vm3, %v412_v28, %v1698_v27  ;;  %v416_v31 = vsel %vm414_vm3, %v413_v29, %v1699_v26  ;;  %v1344_v26 = vld [vmem:[#allocation5] ss:$0 sm:$0xff] }
  0xd9   : > { %v418_v32 = vsel %vm417_vm4, %v415_v30, %v1703_v23  ;;  %v419_v33 = vsel %vm417_vm4, %v416_v31, %v1704_v22  ;;  %v1578_v22 = vpack.c.bf16 %v793_v21, %v792_v20  ;;  %v794_v23 = vld [vmem:[%s2273_s5 + $0x50] sm:$0xff]  ;;  %vm803_vm4 = vcmask 785408  }
  0xda   : > { %v1547_v36 = vpack.c.bf16 %v419_v33, %v418_v32  ;;  %v1581_v25 = vpack.c.bf16 %v795_v24, %v794_v23 }
  0xdc   : > { %1549 = vmatpush3.bf16.msk.msra.mxu1 %vm1548_vm7, %v1547_v36 }
  0xdd   : > { %1550 = vmatprep.subr.bf16.mxu1 %v1836_v3 }
  0xdf   : > { %1422 = vmatmul.mubr.msk.f32.vlgmr.msra.gmra.mrb[0].mxu1 %vm420_vm9, %v1337_v37 }
  0xe0   : > { %1552 = vmatpush3.bf16.msra.mxu1 %v1551_v38  ;;  %1428 = vmatprep.mubr.msk.f32.mxu1 %vm1837_vm2, %v1835_v0  ;;  %v892_v38 = vld [vmem:[%s2275_s7] sm:$0xff] }
  0xe1   : > { %1553 = vmatprep.subr.bf16.mxu1 %v1836_v3 }
 0x1b2   : > { %v494_v39 = vpop.f32.mrb[0].mxu1 }
 0x1b3   : > { %v1423_v40 = vpop.f32.mrb[1].mxu1  ;;  %1429 = vmatmul.mubr.msk.f32.vlgmr.msra.gmra.mrb[2].mxu1 %vm362_vm10, %v494_v39  ;;  %v893_v39 = vld [vmem:[%s2275_s7 + $0x8] sm:$0xff] }
 0x1b4   : > { %1452 = vmatprep.mubr.msk.f32.mxu1 %vm1837_vm2, %v1835_v0  ;;  %1555 = vmatpush3.bf16.msra.mxu1 %v1554_v48  ;;  %v894_v40 = vld [vmem:[%s2275_s7 + $0x10] sm:$0xff]  ;;  %v899_v48 = vld [vmem:[%s2275_s7 + $0x38] sm:$0xff] }
 0x1b5   : > { %1556 = vmatprep.subr.bf16.mxu1 %v1836_v3  ;;  %v1593_v49 = vpack.c.bf16 %v899_v48, %v898_v47 }
 0x1b8   : > { %1558 = vmatpush3.bf16.msra.mxu1 %v1557_v51  ;;  %v901_v51 = vld [vmem:[%s2275_s7 + $0x48] sm:$0xff] }
 0x1b9   : > { %1559 = vmatprep.subr.bf16.mxu1 %v1836_v3  ;;  %v1596_v52 = vpack.c.bf16 %v901_v51, %v900_v50 }
 0x1bc   : > { %1561 = vmatpush3.bf16.msra.mxu1 %v1560_v56  ;;  %v1346_v56 = vld [vmem:[#allocation8] ss:$0 sm:$0xff] }
 0x1bd   : > { %1562 = vmatprep.subr.bf16.mxu1 %v1836_v3 }
 0x1c0   : > { %1564 = vmatpush3.bf16.msra.mxu1 %v1563_v60  ;;  %v978_v60 = vld [vmem:[%s2276_s8] sm:$0xff] }
 0x1c1   : > { %1583 = vmatprep.subr.bf16.mxu1 %v1836_v3 }
 0x286   : > { %v576_v42 = vpop.f32.mrb[2].mxu1 }
 0x287   : > { %v577_v43 = vadd.f32 %v1340_v41, %v576_v42  ;;  %v1430_v44 = vpop.f32.mrb[3].mxu1  ;;  %v1584_v41 = vpack.c.bf16 %v893_v39, %v892_v38  ;;  %v895_v42 = vld [vmem:[%s2275_s7 + $0x18] sm:$0xff] }
 0x288   : > { %v896_v44 = vld [vmem:[%s2275_s7 + $0x20] sm:$0xff] }
 0x289   : > { %v580_v45 = vmax.f32 %v577_v43, 0.0  ;;  %v1587_v43 = vpack.c.bf16 %v895_v42, %v894_v40 }
 0x28b   : > { %581 = vst.msk [vmem:[#allocation3 + $0x1] sm:$0xff] %vm362_vm10, %v580_v45  ;;  %v897_v45 = vld [vmem:[%s2275_s7 + $0x28] sm:$0xff] }
 0x28c   : > { %v1590_v46 = vpack.c.bf16 %v897_v45, %v896_v44 }
 0x292   : > { %v584_v54 = vld [vmem:[#allocation3 + $0x2] sm:$0x7f] }
 0x293   : > { %v583_v55 = vld [vmem:[#allocation3 + $0x1] sm:$0x7f]  ;;  %591 = vrot.lane.b32.xlu0 %v584_v54, %s1842_s21 }
 0x294   : > { %587 = vrot.lane.b32.xlu1 %v583_v55, %s1843_s25  ;;  %v585_v59 = vld [vmem:[#allocation3 + $0x3] sm:$0x7f]  ;;  %s1334_s25 = sshll.u32 %s349_s14, 2 }
 0x295   : > { %v582_v62 = vld [vmem:[#allocation3] sm:$0x7f] }
 0x296   : > { %v903_v54 = vld [vmem:[%s2275_s7 + $0x58] sm:$0xff] }
 0x297   : > { %v1599_v55 = vpack.c.bf16 %v903_v54, %v902_v53 }
 0x298   : > { %595 = vrot.lane.b32.xlu1 %v585_v59, %s1844_s22  ;;  %s1232_s22 = scalar_lea.sflag [#allocation7], %s349_s14 }
 0x305   : > { %v592_v63 = vpop.permute.xlu0 %591 }
 0x306   : > { %v588_v61 = vpop.permute.xlu1 %587 }
 0x307   : > { %v598_v1 = vsel %vm362_vm10, %v582_v62, %v588_v61 }
 0x308   : > { %v600_v4 = vsel %vm599_vm12, %v598_v1, %v592_v63 }
 0x30a   : > { %v596_v2 = vpop.permute.xlu1 %595 }
 0x30b   : > { %v602_v5 = vsel %vm601_vm13, %v600_v4, %v596_v2 }
 0x30c   : > { %1432 = vmatpush3.msk.msra.mxu0 %vm424_vm5, %v602_v5 }
 0x30d   : > { %1434 = vmatmul.mubr.msk.f32.vlgmr.msra.gmra.mrb[0].mxu0 %vm603_vm14, %v1337_v37  ;;  %1565 = vmatprep.subr.bf16.mxu0 %v1836_v3 }
 0x30e   : > { %1479 = vmatprep.mubr.msk.f32.mxu0 %vm1837_vm2, %v1835_v0  ;;  %1567 = vmatpush3.bf16.msra.mxu0 %v1566_v11 }
 0x30f   : > { %1568 = vmatprep.subr.bf16.mxu0 %v1836_v3 }
 0x312   : > { %1570 = vmatpush3.bf16.msra.mxu0 %v1569_v13 }
 0x313   : > { %1571 = vmatprep.subr.bf16.mxu0 %v1836_v3 }
 0x316   : > { %1573 = vmatpush3.bf16.msra.mxu0 %v1572_v16 }
 0x317   : > { %1574 = vmatprep.subr.bf16.mxu0 %v1836_v3 }
 0x31a   : > { %1576 = vmatpush3.bf16.msra.mxu0 %v1575_v19 }
 0x31b   : > { %1577 = vmatprep.subr.bf16.mxu0 %v1836_v3 }
 0x31e   : > { %1579 = vmatpush3.bf16.msra.mxu0 %v1578_v22 }
 0x31f   : > { %1580 = vmatprep.subr.bf16.mxu0 %v1836_v3 }
 0x322   : > { %1582 = vmatpush3.bf16.msra.mxu0 %v1581_v25 }
 0x323   : > { %1509 = vmatprep.subr.mxu0 %v1835_v0 }
 0x3e0   : > { %v675_v6 = vpop.f32.mrb[0].mxu0 }
 0x3e1   : > { %v1435_v7 = vpop.f32.mrb[1].mxu0  ;;  %1453 = vmatmul.mubr.msk.f32.vlgmr.msra.gmra.mrb[4].mxu1 %vm694_vm0, %v675_v6 }
 0x3e2   : > { %1506 = vmatprep.mubr.msk.f32.mxu1 %vm1837_vm2, %v1835_v0  ;;  %1585 = vmatpush3.bf16.msra.mxu1 %v1584_v41 }
 0x3e3   : > { %1586 = vmatprep.subr.bf16.mxu1 %v1836_v3 }
 0x3e6   : > { %1588 = vmatpush3.bf16.msra.mxu1 %v1587_v43 }
 0x3e7   : > { %1589 = vmatprep.subr.bf16.mxu1 %v1836_v3 }
 0x3ea   : > { %1591 = vmatpush3.bf16.msra.mxu1 %v1590_v46 }
 0x3eb   : > { %1592 = vmatprep.subr.bf16.mxu1 %v1836_v3 }
 0x3ee   : > { %1594 = vmatpush3.bf16.msra.mxu1 %v1593_v49 }
 0x3ef   : > { %1595 = vmatprep.subr.bf16.mxu1 %v1836_v3 }
 0x3f2   : > { %1597 = vmatpush3.bf16.msra.mxu1 %v1596_v52 }
 0x3f3   : > { %1598 = vmatprep.subr.bf16.mxu1 %v1836_v3 }
 0x3f6   : > { %1600 = vmatpush3.bf16.msra.mxu1 %v1599_v55 }
 0x3f7   : > { %1541 = vmatprep.subr.mxu1 %v1835_v0 }
 0x4b4   : > { %v764_v27 = vpop.f32.mrb[4].mxu1 }
 0x4b5   : > { %v765_v28 = vadd.f32 %v1344_v26, %v764_v27  ;;  %v1454_v29 = vpop.f32.mrb[5].mxu1 }
 0x4b7   : > { %v768_v30 = vmax.f32 %v765_v28, 0.0 }
 0x4b9   : > { %770 = vst.msk [vmem:[#allocation4 + $0x1] sm:$0xf] %vm769_vm1, %v768_v30 }
 0x4c0   : > { %v773_v31 = vld [vmem:[#allocation4 + $0x2] sm:$0xf] }
 0x4c1   : > { %v772_v32 = vld [vmem:[#allocation4 + $0x1] sm:$0xf]  ;;  %779 = vrot.lane.b32.xlu1 %v773_v31, %s1845_s24 }
 0x4c2   : > { %775 = vrot.lane.b32.xlu0 %v772_v32, %s1842_s21  ;;  %v771_v35 = vld [vmem:[#allocation4] sm:$0xf] }
 0x533   : > { %v780_v33 = vpop.permute.xlu1 %779 }
 0x534   : > { %v776_v34 = vpop.permute.xlu0 %775 }
 0x535   : > { %v782_v36 = vsel %vm599_vm12, %v771_v35, %v776_v34 }
 0x536   : > { %v783_v37 = vsel %vm694_vm0, %v782_v36, %v780_v33 }
 0x537   : > { %1480 = vmatmul.mubr.msk.f32.vlgmr.msra.gmra.mrb[2].mxu0 %vm803_vm4, %v783_v37 }
 0x538   : > { %1511 = vmatprep.mubr.msk.f32.mxu0 %vm1837_vm2, %v1835_v0  ;;  %1510 = vmatpush3.msra.mxu0 %v978_v60 }
 0x539   : > { %1601 = vmatprep.subr.bf16.mxu0 %v1836_v3 }
 0x60a   : > { %v873_v57 = vpop.f32.mrb[2].mxu0 }
 0x60b   : > { %v874_v58 = vadd.f32 %v1346_v56, %v873_v57  ;;  %v1481_v59 = vpop.f32.mrb[3].mxu0 }
 0x60d   : > { %v877_v61 = vmax.f32 %v874_v58, 0.0 }
 0x60f   : > { %878 = vst.msk [vmem:[#allocation4 + $0x1] sm:$0xf] %vm769_vm1, %v877_v61 }
 0x616   : > { %v881_v62 = vld [vmem:[#allocation4 + $0x2] sm:$0xf] }
 0x617   : > { %v880_v63 = vld [vmem:[#allocation4 + $0x1] sm:$0xf]  ;;  %887 = vrot.lane.b32.xlu1 %v881_v62, %s1845_s24 }
 0x618   : > { %883 = vrot.lane.b32.xlu0 %v880_v63, %s1842_s21  ;;  %v879_v4 = vld [vmem:[#allocation4] sm:$0xf] }
 0x689   : > { %v888_v1 = vpop.permute.xlu1 %887 }
 0x68a   : > { %v884_v2 = vpop.permute.xlu0 %883 }
 0x68b   : > { %v890_v5 = vsel %vm599_vm12, %v879_v4, %v884_v2 }
 0x68c   : > { %v891_v6 = vsel %vm694_vm0, %v890_v5, %v888_v1 }
 0x68d   : > { %1507 = vmatmul.mubr.msk.f32.vlgmr.msra.gmra.mrb[6].mxu1 %vm803_vm4, %v891_v6 }
 0x68e   : > { %1542 = vmatpush3.msra.mxu1 %v978_v60  ;;  %1543 = vmatprep.mubr.msk.f32.mxu1 %vm1837_vm2, %v1835_v0 }
 0x760   : > { %v973_v7 = vpop.f32.mrb[6].mxu1 }
 0x761   : > { %v977_v8 = vmax.f32 %v973_v7, 0.0  ;;  %v1508_v9 = vpop.f32.mrb[7].mxu1 }
 0x763   : > { %1512 = vmatmul.mubr.msk.f32.vlgmr.msra.gmra.mrb[4].mxu0 %vm414_vm3, %v977_v8 }
 0x764   : > { %1603 = vmatpush3.bf16.msra.mxu0 %v1584_v41  ;;  %1538 = vmatprep.mubr.msk.f32.mxu0 %vm1837_vm2, %v1835_v0 }
 0x765   : > { %1604 = vmatprep.subr.bf16.mxu0 %v1836_v3 }
 0x768   : > { %1606 = vmatpush3.bf16.msra.mxu0 %v1587_v43 }
 0x769   : > { %1607 = vmatprep.subr.bf16.mxu0 %v1836_v3 }
 0x76c   : > { %1609 = vmatpush3.bf16.msra.mxu0 %v1590_v46 }
 0x76d   : > { %1610 = vmatprep.subr.bf16.mxu0 %v1836_v3 }
 0x770   : > { %1612 = vmatpush3.bf16.msra.mxu0 %v1593_v49 }
 0x771   : > { %1613 = vmatprep.subr.bf16.mxu0 %v1836_v3 }
 0x774   : > { %1615 = vmatpush3.bf16.msra.mxu0 %v1596_v52 }
 0x775   : > { %1616 = vmatprep.subr.bf16.mxu0 %v1836_v3 }
 0x778   : > { %1618 = vmatpush3.bf16.msra.mxu0 %v1599_v55 }
 0x836   : > { %v1048_v10 = vpop.f32.mrb[4].mxu0 }
 0x837   : > { %v1052_v11 = vadd.f32 %v1048_v10, %v874_v58  ;;  %v1513_v12 = vpop.f32.mrb[5].mxu0 }
 0x839   : > { %v1053_v13 = vmax.f32 %v1052_v11, 0.0 }
 0x83b   : > { %1054 = vst.msk [vmem:[#allocation4 + $0x1] sm:$0xf] %vm769_vm1, %v1053_v13 }
 0x842   : > { %v1057_v0 = vld [vmem:[#allocation4 + $0x2] sm:$0xf] }
 0x843   : > { %v1056_v14 = vld [vmem:[#allocation4 + $0x1] sm:$0xf]  ;;  %1063 = vrot.lane.b32.xlu1 %v1057_v0, %s1845_s24  ;;  %s1353_s24 = sshll.u32 %s1918_s13, 6  ;;  %s1846_s13 = smov [#allocation10]  }
 0x844   : > { %1059 = vrot.lane.b32.xlu0 %v1056_v14, %s1842_s21  ;;  %v1055_v17 = vld [vmem:[#allocation4] sm:$0xf]  ;;  %s351_s21 = scalar_lea.vmem [#allocation10], %s1334_s25  ;;  %s2225_s17 = scalar_lea.hbm %s2277_s9, %s1353_s24 }
 0x845   : > { %s1245_s26 = sshll.u32 %s351_s21, 4  ;;  %s1765_s23 = sshll.u32 %s1846_s13, 4  ;;  %s2227_s26 = int_to_ptr.vmem [resolvable:$true] %s1245_s26  ;;  %s1766_s23 = int_to_ptr.vmem [resolvable:$false] %s1765_s23 }
 0x846   : > { %s1761_s27 = scalar_lea.vmem %s2227_s26, 64  ;;  %s1767_s18 = scalar_lea.vmem %s1766_s23, 128 }
 0x847   : > { %p1762_p12 = scmp.ne.s32.totalorder %s2227_s26, %s1761_s27  ;;  %p1768_p4 = scmp.lt.s32.totalorder %s2227_s26, %s1766_s23 }
 0x848   : > { %p1769_p7 = scmp.lt.s32.totalorder %s1767_s18, %s1761_s27 }
 0x849   : > { %p1763_p2 = pnand %p1762_p12, %p2291_p1 }
 0x84a   : > { %p1770_p8 = por %p1769_p7, %p1768_p4 }
 0x84b   : > { %p1764_p3 = pneg %p1763_p2 }
 0x84d   : > { %p1771_p11 = pnand %p1770_p8, %p1764_p3 }
 0x8b5   : > { %v1064_v15 = vpop.permute.xlu1 %1063 }
 0x8b6   : > { %v1060_v16 = vpop.permute.xlu0 %1059 }
 0x8b7   : > { %v1066_v3 = vsel %vm599_vm12, %v1055_v17, %v1060_v16 }
 0x8b8   : > { %v1067_v18 = vsel %vm694_vm0, %v1066_v3, %v1064_v15 }
 0x8b9   : > { %1539 = vmatmul.mubr.msk.f32.vlgmr.msra.gmra.mrb[6].mxu0 %vm803_vm4, %v1067_v18 }
 0x98c   : > { %v1149_v19 = vpop.f32.mrb[6].mxu0 }
 0x98d   : > { %v1153_v20 = vmax.f32 %v1149_v19, 0.0  ;;  %v1540_v21 = vpop.f32.mrb[7].mxu0 }
 0x98f   : > { %1544 = vmatmul.mubr.msk.f32.vlgmr.msra.gmra.mrb[8].mxu1 %vm414_vm3, %v1153_v20 }
 0xa62   : > { %v1224_v22 = vpop.f32.mrb[8].mxu1 }
 0xa63   : > { %v1228_v23 = vadd.f32 %v1224_v22, %v1052_v11  ;;  %v1545_v24 = vpop.f32.mrb[9].mxu1 }
 0xa65   : > { %v1229_v25 = vmax.f32 %v1228_v23, 0.0 }
 0xa67   : > { %1230 = vst.msk [vmem:[%s351_s21] sm:$0xf] %vm769_vm1, %v1229_v25 }
 0xa68   : > { %1774 = shalt.err (!%p1771_p11)
}
 0xa69   : > { %s1775_s28 = scalar_lea.hbm %s2225_s17, 64  ;;  %s1779_s24 = scalar_lea.hbm %s2277_s9, 128 }
 0xa6a   : > { %p1776_p13 = scmp.ne.s32.totalorder %s2225_s17, %s1775_s28  ;;  %p1780_p5 = scmp.lt.u32.totalorder %s2225_s17, %s2277_s9 }
 0xa6b   : > { %p1781_p9 = scmp.lt.u32.totalorder %s1779_s24, %s1775_s28  ;;  %p1783_p12 = scmp.lt.u32.totalorder %s1775_s28, %s2225_s17 }
 0xa6c   : > { %p1777_p0 = pnand %p1776_p13, %p2291_p1 }
 0xa6d   : > { %p1782_p10 = por %p1781_p9, %p1780_p5 }
 0xa6e   : > { %p1778_p6 = pneg %p1777_p0 }
 0xa6f   : > { %p1784_p2 = por %p1783_p12, %p1782_p10 }
 0xa71   : > { %p1785_p3 = pnand %p1784_p2, %p1778_p6 }
 0xa73   : > { %1788 = shalt.err (!%p1785_p3)
}
 0xa74   : > { %1627 = dma.vmem_to_hbm [thread:$0]  (%p2291_p1), %s2227_s26, 64, %s2225_s17, %s1232_s22  }
 0xa75 PF: > { %p1644_p4 = scmp.ge.s32.totalorder %s1831_s12, 2  ;;  %s1257_s16 = sand.u32 1, %s1819_s30  }
 0xa76   : > { %p2292_p7 = scmp.ne.s32.totalorder %s2283_s20, 0  ;;  %s1258_s27 = scalar_lea.sflag [#allocation7], %s1257_s16 }
 0xa78   : > { %p1637_p8 = pnand %p1644_p4, %p2292_p7 }
 0xa7a   : > { %1814 = dma.done.wait (!%p1637_p8), %s1258_s27, 64  }
 0xa7b   : > { %1816 = vsyncadd (!%p1637_p8), %s1258_s27, 4294967232  ;;  %s2293_s13 = sld [smem:[#allocation14_spill]]  ;;  %p21_p11 = scmp.ge.s32.totalorder %s1922_s15, 4  }
 0xa7c   : > { %s2294_s30 = smov %s1823_s10  ;;  %s2295_s10 = smov %s1827_s11 }
 0xa7d   : > { %s2297_s12 = smov %s1922_s15  ;;  %23 = sbr.rel (!%p21_p11) target bundleno = 5 (0x5), region = 100 }
 0xa81   : > { %s2296_s11 = smov %s2293_s13 }
 0xa84   :  { %1263 = vsyncpa [#allocation6], 1 }
 0xa85   :  { %1265 = vsyncpa [#allocation6 + $0x1], 1 }
 0xa86   :  { %1266 = vsyncpa [#allocation9], 1 }
 0xa87   :  { %1267 = vsyncpa [#allocation7], 1 }
 0xa88   :  { %1269 = vsyncpa [#allocation7 + $0x1], 1 }

</bundles_post_ra>
